<compile_context>
chip_gen: v6e
topology: v6e:2x2x1
jax: 0.10.0
libtpu: 0.0.40
codegen_flags: <defaults>
</compile_context>

<pallas_src>
import jax
import jax.numpy as jnp
from jax.experimental import pallas as pl
from jax.experimental.pallas import tpu as pltpu


def _round_up(x, m):
    return (x + m - 1) // m * m


_VMEM_BUDGET = 24 << 20   # per-step working-set budget (safe on v7x: 64 MiB phys)
_VMEM_LIMIT = 48 << 20    # scoped-VMEM cap: > v5e's 16 MiB default, < v7x physical


# ---------------------------------------------------------------------------
# Kernels
# ---------------------------------------------------------------------------
def _head_kernel_resident(x_ref, w1_ref, b1_ref, w2_ref, b2_ref, o_ref):
    """Fast path: grid = (batch tiles,), W1 fully VMEM-resident, no K axis."""
    # f32 X tile -> bf16 on the VPU right before the MXU (no HBM copy of X).
    x = x_ref[...].astype(jnp.bfloat16)
    h = jnp.dot(x, w1_ref[...], preferred_element_type=jnp.float32)
    h = jnp.maximum(h + b1_ref[...], 0.0)                 # bias + ReLU in f32
    o = jnp.dot(h.astype(w2_ref.dtype), w2_ref[...],
                preferred_element_type=jnp.float32) + b2_ref[...]
    o_ref[...] = o.astype(o_ref.dtype)


def _head_kernel_ktiled(x_ref, w1_ref, b1_ref, w2_ref, b2_ref, o_ref, h_acc):
    """General path: grid = (batch tiles [parallel], K tiles over F [arbitrary])."""
    k = pl.program_id(1)

    @pl.when(k == 0)
    def _():
        h_acc[...] = jnp.zeros_like(h_acc)

    # body matmul: accumulate X(tb, tk) @ W1(tk, Hd_pad) in f32
    h_acc[...] += jnp.dot(x_ref[...].astype(jnp.bfloat16), w1_ref[...],
                          preferred_element_type=jnp.float32)

    @pl.when(k == pl.num_programs(1) - 1)
    def _():
        h = jnp.maximum(h_acc[...] + b1_ref[...], 0.0)
        o = jnp.dot(h.astype(w2_ref.dtype), w2_ref[...],
                    preferred_element_type=jnp.float32) + b2_ref[...]
        o_ref[...] = o.astype(o_ref.dtype)


# ---------------------------------------------------------------------------
# One-time parameter prep (hoisted out of the per-step forward)
# ---------------------------------------------------------------------------
def prepare_head_params(w1, b1, w2, b2):
    """Pad + cast weights once. w1: (F, Hd), w2: (Hd, A). Returns padded params."""
    F, Hd = w1.shape
    A = w2.shape[1]
    F_pad = _round_up(F, 512)        # multiple of 512 -> always has a valid K tile
    Hd_pad = _round_up(Hd, 128)      # lane-dense intermediate
    A_pad = _round_up(A, 128)        # lane-dense output (unmasked stores)

    w1_p = jnp.zeros((F_pad, Hd_pad), jnp.bfloat16).at[:F, :Hd].set(
        w1.astype(jnp.bfloat16))
    b1_p = jnp.zeros((1, Hd_pad), jnp.float32).at[:, :Hd].set(
        b1.reshape(1, Hd).astype(jnp.float32))
    w2_p = jnp.zeros((Hd_pad, A_pad), jnp.bfloat16).at[:Hd, :A].set(
        w2.astype(jnp.bfloat16))
    b2_p = jnp.zeros((1, A_pad), jnp.float32).at[:, :A].set(
        b2.reshape(1, A).astype(jnp.float32))
    return w1_p, b1_p, w2_p, b2_p, A


# ---------------------------------------------------------------------------
# Forward
# ---------------------------------------------------------------------------
def head_forward(x_nchw, w1_p, b1_p, w2_p, b2_p, actions, *, tb=None, tk=None):
    """x_nchw: (B, C, H, W) float32. Returns (B, actions) float32."""
    B = x_nchw.shape[0]
    x = x_nchw.reshape(B, -1).astype(jnp.float32)     # torch: X.view(B, -1)
    F = x.shape[1]
    F_pad, Hd_pad = w1_p.shape
    A_pad = w2_p.shape[1]
    assert F <= F_pad, "x features exceed prepared W1 rows"

    # batch tile: multiple of 8; >= 2 tiles when possible so the "parallel"
    # batch axis feeds both TensorCores on v7x.
    B8 = _round_up(B, 8)
    if tb is None:
        if B8 >= 1024:
            tb = 512
        elif B8 >= 16:
            tb = _round_up((B8 + 1) // 2, 8)
        else:
            tb = B8
    B_pad = _round_up(B, tb)

    # fast path decision: W1 fully resident (conservatively counted double-
    # buffered) + f32 X tile + output within the per-step VMEM budget.
    small = 2 * (Hd_pad * A_pad * 2 + Hd_pad * 4 + A_pad * 4)
    fast_bytes = (2 * F_pad * Hd_pad * 2      # W1 (bf16)
                  + 2 * tb * F_pad * 4        # X (f32), double buffered
                  + 2 * tb * A_pad * 4        # out (f32), double buffered
                  + small)
    use_fast = tk is None and fast_bytes <= _VMEM_BUDGET

    if not use_fast:
        if tk is None:
            for cand in (2048, 1536, 1024, 512):
                if F_pad % cand == 0:
                    tk = cand
                    break
        assert F_pad % tk == 0, "tk must divide the padded feature dim"
        grid = (B_pad // tb, F_pad // tk)
    else:
        grid = (B_pad // tb,)

    # pad X (f32, zeros) only to block multiples; numerical correctness of the
    # F remainder comes from W1's zeroed rows, zero X padding keeps it NaN-free.
    if B_pad != B or F_pad != F:
        x = jnp.pad(x, ((0, B_pad - B), (0, F_pad - F)))

    flops = 2 * B_pad * (F_pad * Hd_pad + Hd_pad * A_pad)
    bytes_accessed = (B_pad * F_pad * 4 + F_pad * Hd_pad * 2
                      + Hd_pad * A_pad * 2 + (Hd_pad + A_pad) * 4
                      + B_pad * A_pad * 4)

    common = dict(
        out_shape=jax.ShapeDtypeStruct((B_pad, A_pad), jnp.float32),
        compiler_params=pltpu.CompilerParams(
            dimension_semantics=(("parallel",) if use_fast
                                 else ("parallel", "arbitrary")),
            vmem_limit_bytes=_VMEM_LIMIT),
        cost_estimate=pl.CostEstimate(
            flops=flops, transcendentals=0, bytes_accessed=bytes_accessed),
    )

    if use_fast:
        out = pl.pallas_call(
            _head_kernel_resident,
            grid_spec=pltpu.PrefetchScalarGridSpec(
                num_scalar_prefetch=0,
                grid=grid,
                in_specs=[
                    pl.BlockSpec((tb, F_pad), lambda i: (i, 0)),        # X tile
                    pl.BlockSpec((F_pad, Hd_pad), lambda i: (0, 0)),    # W1 resident
                    pl.BlockSpec((1, Hd_pad), lambda i: (0, 0)),        # b1
                    pl.BlockSpec((Hd_pad, A_pad), lambda i: (0, 0)),    # W2 resident
                    pl.BlockSpec((1, A_pad), lambda i: (0, 0)),         # b2
                ],
                out_specs=pl.BlockSpec((tb, A_pad), lambda i: (i, 0)),
            ),
            **common,
        )(x, w1_p, b1_p, w2_p, b2_p)
    else:
        out = pl.pallas_call(
            _head_kernel_ktiled,
            grid_spec=pltpu.PrefetchScalarGridSpec(
                num_scalar_prefetch=0,
                grid=grid,
                in_specs=[
                    pl.BlockSpec((tb, tk), lambda i, k: (i, k)),         # X tile
                    pl.BlockSpec((tk, Hd_pad), lambda i, k: (k, 0)),     # W1 K-slab
                    pl.BlockSpec((1, Hd_pad), lambda i, k: (0, 0)),      # b1
                    pl.BlockSpec((Hd_pad, A_pad), lambda i, k: (0, 0)),  # W2
                    pl.BlockSpec((1, A_pad), lambda i, k: (0, 0)),       # b2
                ],
                out_specs=pl.BlockSpec((tb, A_pad), lambda i, k: (i, 0)),
                scratch_shapes=[pltpu.VMEM((tb, Hd_pad), jnp.float32)],
            ),
            **common,
        )(x, w1_p, b1_p, w2_p, b2_p)

    # strip padding; torch: .view(-1, self._output_actions)
    return out[:B, :actions].reshape(-1, actions)


def init_params(key, in_features, hidden, actions):
    """PyTorch-style Linear init: U(-1/sqrt(fan_in), 1/sqrt(fan_in))."""
    k1, k2, k3, k4 = jax.random.split(key, 4)
    lim1 = 1.0 / jnp.sqrt(in_features)
    lim2 = 1.0 / jnp.sqrt(hidden)
    # weights stored transposed to (in, out) so the kernel does x @ W
    w1 = jax.random.uniform(k1, (in_features, hidden), jnp.float32, -lim1, lim1)
    b1 = jax.random.uniform(k2, (hidden,), jnp.float32, -lim1, lim1)
    w2 = jax.random.uniform(k3, (hidden, actions), jnp.float32, -lim2, lim2)
    b2 = jax.random.uniform(k4, (actions,), jnp.float32, -lim2, lim2)
    return w1, b1, w2, b2


if __name__ == "__main__":
    # small shapes: batch=2, channels=4, spatial=16x16, hidden=32, actions=8
    B, C, H, W = 2, 4, 16, 16
    HIDDEN = 32          # body._fc_hidden_layer_size
    ACTIONS = 8          # output_actions

    key = jax.random.PRNGKey(0)
    kx, kp = jax.random.split(key)
    x = jax.random.normal(kx, (B, C, H, W), jnp.float32)
    w1, b1, w2, b2 = init_params(kp, C * H * W, HIDDEN, ACTIONS)

    # one-time parameter prep (would be cached across agent steps)
    w1_p, b1_p, w2_p, b2_p, A = prepare_head_params(w1, b1, w2, b2)

    # bf16-operand reference (same casting as the kernel) and pure-f32 ref
    def ref_bf16_fn(x_in):
        xf = x_in.reshape(x_in.shape[0], -1)
        h = jnp.maximum(
            jnp.dot(xf.astype(jnp.bfloat16), w1.astype(jnp.bfloat16),
                    preferred_element_type=jnp.float32) + b1, 0.0)
        return jnp.dot(h.astype(jnp.bfloat16), w2.astype(jnp.bfloat16),
                       preferred_element_type=jnp.float32) + b2

    def ref_f32_fn(x_in):
        xf = x_in.reshape(x_in.shape[0], -1)
        return jnp.maximum(xf @ w1 + b1, 0.0) @ w2 + b2

    # 1) fast path (W1 resident, grid over batch only)
    out = jax.block_until_ready(head_forward(x, w1_p, b1_p, w2_p, b2_p, A))
    assert out.shape == (B, ACTIONS)
    assert jnp.allclose(out, ref_bf16_fn(x), atol=2e-3, rtol=2e-3)
    assert jnp.allclose(out, ref_f32_fn(x), atol=5e-2, rtol=5e-2)

    # 2) multi batch-tile path (batch padding + 2 "parallel" tiles)
    B2 = 20
    x2 = jax.random.normal(jax.random.PRNGKey(2), (B2, C, H, W), jnp.float32)
    out2 = jax.block_until_ready(head_forward(x2, w1_p, b1_p, w2_p, b2_p, A))
    assert out2.shape == (B2, ACTIONS)
    assert jnp.allclose(out2, ref_bf16_fn(x2), atol=2e-3, rtol=2e-3)

    # 3) forced K-tiled accumulator path (exercise the large-F fallback)
    out3 = jax.block_until_ready(
        head_forward(x, w1_p, b1_p, w2_p, b2_p, A, tk=512))
    assert out3.shape == (B, ACTIONS)
    assert jnp.allclose(out3, ref_bf16_fn(x), atol=2e-3, rtol=2e-3)

    print("KERNEL_OK")
</pallas_src>

<mosaic_0001>
module attributes {stable_mosaic.version = 11 : i64} {
  func.func @_head_kernel_resident(%arg0: i32, %arg1: memref<8x1024xf32, #tpu.memory_space<vmem>>, %arg2: memref<1024x128xbf16, #tpu.memory_space<vmem>>, %arg3: memref<1x128xf32, #tpu.memory_space<vmem>>, %arg4: memref<128x128xbf16, #tpu.memory_space<vmem>>, %arg5: memref<1x128xf32, #tpu.memory_space<vmem>>, %arg6: memref<8x128xf32, #tpu.memory_space<vmem>>) attributes {dimension_semantics = [#tpu.dimension_semantics<parallel>], iteration_bounds = array<i64: 1>, scalar_prefetch = 0 : i64, scratch_operands = 0 : i64, tpu.core_type = #tpu.core_type<tc>, window_params = [{transform_indices = @transform_0, window_bounds = array<i64: 8, 1024>}, {pipeline_mode = #tpu.pipeline_mode<synchronous>, transform_indices = @transform_1, window_bounds = array<i64: 1024, 128>}, {pipeline_mode = #tpu.pipeline_mode<synchronous>, transform_indices = @transform_2, window_bounds = array<i64: 1, 128>}, {pipeline_mode = #tpu.pipeline_mode<synchronous>, transform_indices = @transform_3, window_bounds = array<i64: 128, 128>}, {pipeline_mode = #tpu.pipeline_mode<synchronous>, transform_indices = @transform_4, window_bounds = array<i64: 1, 128>}, {transform_indices = @transform_5, window_bounds = array<i64: 8, 128>}]} {
    %c0 = arith.constant 0 : index
    %c0_0 = arith.constant 0 : index
    %0 = vector.load %arg1[%c0, %c0_0] : memref<8x1024xf32, #tpu.memory_space<vmem>>, vector<8x1024xf32>
    %1 = arith.truncf %0 : vector<8x1024xf32> to vector<8x1024xbf16>
    %c0_1 = arith.constant 0 : index
    %c0_2 = arith.constant 0 : index
    %2 = vector.load %arg2[%c0_1, %c0_2] : memref<1024x128xbf16, #tpu.memory_space<vmem>>, vector<1024x128xbf16>
    %cst = arith.constant dense<0.000000e+00> : vector<8x128xf32>
    %3 = tpu.matmul %1, %2, %cst {dimension_numbers = #tpu.dot_dimension_numbers<[1], [0], [0], [1], [0, 0, 1, 1], [], []>} : vector<8x1024xbf16>, vector<1024x128xbf16>, vector<8x128xf32> -> vector<8x128xf32>
    %c0_3 = arith.constant 0 : index
    %c0_4 = arith.constant 0 : index
    %4 = vector.load %arg3[%c0_3, %c0_4] : memref<1x128xf32, #tpu.memory_space<vmem>>, vector<1x128xf32>
    %5 = vector.broadcast %4 : vector<1x128xf32> to vector<8x128xf32>
    %6 = arith.addf %3, %5 : vector<8x128xf32>
    %cst_5 = arith.constant 0.000000e+00 : f32
    %7 = vector.broadcast %cst_5 : f32 to vector<8x128xf32>
    %8 = arith.maximumf %6, %7 : vector<8x128xf32>
    %9 = arith.truncf %8 : vector<8x128xf32> to vector<8x128xbf16>
    %c0_6 = arith.constant 0 : index
    %c0_7 = arith.constant 0 : index
    %10 = vector.load %arg4[%c0_6, %c0_7] : memref<128x128xbf16, #tpu.memory_space<vmem>>, vector<128x128xbf16>
    %cst_8 = arith.constant dense<0.000000e+00> : vector<8x128xf32>
    %11 = tpu.matmul %9, %10, %cst_8 {dimension_numbers = #tpu.dot_dimension_numbers<[1], [0], [0], [1], [0, 0, 1, 1], [], []>} : vector<8x128xbf16>, vector<128x128xbf16>, vector<8x128xf32> -> vector<8x128xf32>
    %c0_9 = arith.constant 0 : index
    %c0_10 = arith.constant 0 : index
    %12 = vector.load %arg5[%c0_9, %c0_10] : memref<1x128xf32, #tpu.memory_space<vmem>>, vector<1x128xf32>
    %13 = vector.broadcast %12 : vector<1x128xf32> to vector<8x128xf32>
    %14 = arith.addf %11, %13 : vector<8x128xf32>
    %c0_11 = arith.constant 0 : index
    %c0_12 = arith.constant 0 : index
    %15 = vector.load %arg6[%c0_11, %c0_12] : memref<8x128xf32, #tpu.memory_space<vmem>>, vector<8x128xf32>
    tpu.vector_store %arg6[%c0_11, %c0_12], %14 {strides = array<i32>} : memref<8x128xf32, #tpu.memory_space<vmem>>, vector<8x128xf32>,
    return
  }
  func.func @transform_0(%arg0: i32) -> (i32, i32) {
    %c0_i32 = arith.constant 0 : i32
    %c0_i32_0 = arith.constant 0 : i32
    return %arg0, %c0_i32 : i32, i32
  }
  func.func @transform_1(%arg0: i32) -> (i32, i32) {
    %c0_i32 = arith.constant 0 : i32
    %c0_i32_0 = arith.constant 0 : i32
    %c0_i32_1 = arith.constant 0 : i32
    return %c0_i32, %c0_i32_0 : i32, i32
  }
  func.func @transform_2(%arg0: i32) -> (i32, i32) {
    %c0_i32 = arith.constant 0 : i32
    %c0_i32_0 = arith.constant 0 : i32
    %c0_i32_1 = arith.constant 0 : i32
    return %c0_i32, %c0_i32_0 : i32, i32
  }
  func.func @transform_3(%arg0: i32) -> (i32, i32) {
    %c0_i32 = arith.constant 0 : i32
    %c0_i32_0 = arith.constant 0 : i32
    %c0_i32_1 = arith.constant 0 : i32
    return %c0_i32, %c0_i32_0 : i32, i32
  }
  func.func @transform_4(%arg0: i32) -> (i32, i32) {
    %c0_i32 = arith.constant 0 : i32
    %c0_i32_0 = arith.constant 0 : i32
    %c0_i32_1 = arith.constant 0 : i32
    return %c0_i32, %c0_i32_0 : i32, i32
  }
  func.func @transform_5(%arg0: i32) -> (i32, i32) {
    %c0_i32 = arith.constant 0 : i32
    %c0_i32_0 = arith.constant 0 : i32
    return %arg0, %c0_i32 : i32, i32
  }
}

</mosaic_0001>

<bundles_post_ra>
// kernel: tpu_custom_call.1
= control target key start
LH: loop header
LB: loop body
LE: loop exit
PB: predicated region body
PF: predicated region fallthrough
CT: control target
= control target key end

     0   :  { %10 = vsyncpa [#allocation3], 0  ;;  %s1299_s0 = inlined_call_operand.hbm [shape: f32[8,1024], index: 0, kind: input, shape index: {}]   ;;  %s1300_s1 = inlined_call_operand.hbm [shape: bf16[1024,128], index: 1, kind: input, shape index: {}]   ;;  %s1301_s2 = inlined_call_operand.vmem [shape: f32[1,128], index: 2, kind: input, shape index: {}]   ;;  %s1302_s3 = inlined_call_operand.hbm [shape: bf16[128,128], index: 3, kind: input, shape index: {}]   ;;  %s1303_s4 = inlined_call_operand.vmem [shape: f32[1,128], index: 4, kind: input, shape index: {}]   ;;  %s1304_s5 = inlined_call_operand.hbm [shape: f32[8,128], index: 5, kind: output, shape index: {}]  }
   0x1   :  { %11 = vsyncpa [#allocation6], 0 }
   0x2   :  { %12 = vsyncpa [#allocation4], 0  ;;  %s1243_s18 = smov [#allocation5]  }
   0x3   :  { %s28_s19 = sshll.u32 %s1243_s18, 4  ;;  %s29_s19 = int_to_ptr.vmem [resolvable:$true] %s28_s19 }
   0x4   :  { %s1165_s20 = scalar_lea.vmem %s29_s19, 8192  ;;  %p1170_p1 = scmp.lt.s32.totalorder %s29_s19, %s29_s19 }
   0x5   :  { %p1166_p0 = scmp.ne.s32.totalorder %s29_s19, %s1165_s20  ;;  %p1171_p2 = scmp.lt.s32.totalorder %s1165_s20, %s1165_s20 }
   0x7   :  { %p1172_p3 = por %p1171_p2, %p1170_p1 }
   0x9   :  { %p1173_p4 = pnand %p1172_p3, %p1166_p0 }
   0xb   :  { %1176 = shalt.err (!%p1173_p4)
}
   0xc   :  { %s1244_s21 = smov 64   ;;  %s1245_s22 = smov 4  }
   0xd   :  { %34 = dma.hbm_to_vmem [thread:$0]  %s1300_s1, 8192, %s29_s19, [#allocation6], %s1244_s21, %s1244_s21, %s1245_s22  }
   0xe   :  { %s1246_s25 = smov [#allocation2]   ;;  %s1247_s27 = smov [#allocation7]  }
   0xf   :  { %s19_s26 = sshll.u32 %s1246_s25, 4  ;;  %s42_s28 = sshll.u32 %s1247_s27, 4  ;;  %s20_s26 = int_to_ptr.vmem [resolvable:$true] %s19_s26  ;;  %s43_s28 = int_to_ptr.vmem [resolvable:$true] %s42_s28 }
  0x10   :  { %s1185_s29 = scalar_lea.vmem %s20_s26, 1024  ;;  %p1190_p6 = scmp.lt.s32.totalorder %s20_s26, %s20_s26 }
  0x11   :  { %p1186_p5 = scmp.ne.s32.totalorder %s20_s26, %s1185_s29  ;;  %p1191_p7 = scmp.lt.s32.totalorder %s1185_s29, %s1185_s29 }
  0x13   :  { %p1192_p8 = por %p1191_p7, %p1190_p6 }
  0x15   :  { %p1193_p9 = pnand %p1192_p8, %p1186_p5 }
  0x17   :  { %1196 = shalt.err (!%p1193_p9)
}
  0x18   :  { %22 = dma.hbm_to_vmem [thread:$0]  %s1299_s0, 1024, %s20_s26, [#allocation3]  }
  0x19   :  { %s1205_s7 = scalar_lea.vmem %s43_s28, 1024  ;;  %p1210_p11 = scmp.lt.s32.totalorder %s43_s28, %s43_s28 }
  0x1a   :  { %p1206_p10 = scmp.ne.s32.totalorder %s43_s28, %s1205_s7  ;;  %p1211_p12 = scmp.lt.s32.totalorder %s1205_s7, %s1205_s7 }
  0x1c   :  { %p1212_p13 = por %p1211_p12, %p1210_p11 }
  0x1e   :  { %p1213_p0 = pnand %p1212_p13, %p1206_p10 }
  0x20   :  { %1216 = shalt.err (!%p1213_p0)
}
  0x21   :  { %48 = dma.hbm_to_vmem [thread:$0]  %s1302_s3, 1024, %s43_s28, [#allocation6], %s1244_s21, %s1244_s21, %s1245_s22  }
  0x22   :  { %1237 = dma.done.wait [#allocation3], 1024  }
  0x23   :  { %1238 = vsyncadd [#allocation3], 4294966272 }
  0x24   :  { %1239 = dma.done.wait [#allocation6], 9216  }
  0x25   :  { %1240 = vsyncadd [#allocation6], 4294958080  ;;  %v1085_v0 = vld [vmem:[#allocation5 + $0x78] sm:$0xff]   ;;  %v1089_v4 = vld [vmem:[#allocation5 + $0x70] sm:$0xff]   ;;  %vm1249_vm0 = vmmov 0   ;;  %s1250_s10 = smov [#allocation8]  }
  0x26   :  { %v1086_v1 = vld [vmem:[#allocation5 + $0xf8] sm:$0xff]   ;;  %960 = vmatprep.subr.bf16.mxu0 %v1085_v0  ;;  %v1090_v5 = vld [vmem:[#allocation5 + $0xf0] sm:$0xff]   ;;  %v1093_v8 = vld [vmem:[#allocation5 + $0x68] sm:$0xff]   ;;  %s876_s11 = sshll.u32 %s1250_s10, 4  ;;  %s877_s11 = int_to_ptr.vmem [resolvable:$true] %s876_s11 }
  0x27   :  { %v1087_v2 = vld [vmem:[#allocation5 + $0x38] sm:$0xff]   ;;  %982 = vmatprep.subr.bf16.mxu1 %v1086_v1  ;;  %v1091_v6 = vld [vmem:[#allocation5 + $0x30] sm:$0xff]   ;;  %v1094_v9 = vld [vmem:[#allocation5 + $0xe8] sm:$0xff]   ;;  %s1217_s12 = scalar_lea.vmem %s877_s11, 128  ;;  %p1222_p2 = scmp.lt.s32.totalorder %s877_s11, %s877_s11 }
  0x28   :  { %v1088_v3 = vld [vmem:[#allocation5 + $0xb8] sm:$0xff]   ;;  %961 = vmatpush3.bf16.msra.mxu0 %v1087_v2  ;;  %v1092_v7 = vld [vmem:[#allocation5 + $0xb0] sm:$0xff]   ;;  %v1095_v10 = vld [vmem:[#allocation5 + $0x28] sm:$0xff]   ;;  %p1218_p1 = scmp.ne.s32.totalorder %s877_s11, %s1217_s12  ;;  %p1223_p3 = scmp.lt.s32.totalorder %s1217_s12, %s1217_s12 }
  0x29   :  { %983 = vmatpush3.bf16.msra.mxu1 %v1088_v3  ;;  %962 = vmatprep.subr.bf16.mxu0 %v1089_v4  ;;  %v1096_v11 = vld [vmem:[#allocation5 + $0xa8] sm:$0xff]   ;;  %v1097_v12 = vld [vmem:[#allocation5 + $0x60] sm:$0xff]   ;;  %v1101_v16 = vld [vmem:[#allocation5 + $0x58] sm:$0xff]  }
  0x2a   :  { %984 = vmatprep.subr.bf16.mxu1 %v1090_v5  ;;  %v1098_v13 = vld [vmem:[#allocation5 + $0xe0] sm:$0xff]   ;;  %v1102_v17 = vld [vmem:[#allocation5 + $0xd8] sm:$0xff]   ;;  %v1105_v20 = vld [vmem:[#allocation5 + $0x50] sm:$0xff]   ;;  %p1224_p4 = por %p1223_p3, %p1222_p2 }
  0x2b   :  { %v1099_v14 = vld [vmem:[#allocation5 + $0x20] sm:$0xff]   ;;  %v1103_v18 = vld [vmem:[#allocation5 + $0x18] sm:$0xff]   ;;  %v1106_v21 = vld [vmem:[#allocation5 + $0xd0] sm:$0xff]  }
  0x2c   :  { %963 = vmatpush3.bf16.msra.mxu0 %v1091_v6  ;;  %v1100_v15 = vld [vmem:[#allocation5 + $0xa0] sm:$0xff]   ;;  %v1104_v19 = vld [vmem:[#allocation5 + $0x98] sm:$0xff]   ;;  %v1107_v22 = vld [vmem:[#allocation5 + $0x10] sm:$0xff]   ;;  %p1225_p5 = pnand %p1224_p4, %p1218_p1 }
  0x2d   :  { %985 = vmatpush3.bf16.msra.mxu1 %v1092_v7  ;;  %964 = vmatprep.subr.bf16.mxu0 %v1093_v8  ;;  %v1108_v23 = vld [vmem:[#allocation5 + $0x90] sm:$0xff]   ;;  %v1109_v24 = vld [vmem:[#allocation5 + $0x48] sm:$0xff]   ;;  %v1113_v28 = vld [vmem:[#allocation5 + $0x40] sm:$0xff]  }
  0x2e   :  { %986 = vmatprep.subr.bf16.mxu1 %v1094_v9  ;;  %v1110_v25 = vld [vmem:[#allocation5 + $0xc8] sm:$0xff]   ;;  %v1114_v29 = vld [vmem:[#allocation5 + $0xc0] sm:$0xff]   ;;  %v64_v33 = vld [vmem:[#allocation2 + $0x18] sm:$0xff] }
  0x2f   :  { %v1111_v26 = vld [vmem:[#allocation5 + $0x8] sm:$0xff]   ;;  %v1115_v30 = vld [vmem:[#allocation5] sm:$0xff]   ;;  %v72_v36 = vpack.c.bf16 %v64_v33, %v64_v33  ;;  %v63_v38 = vld [vmem:[#allocation2 + $0x10] sm:$0xff] }
  0x30   :  { %965 = vmatpush3.bf16.msra.mxu0 %v1095_v10  ;;  %v1112_v27 = vld [vmem:[#allocation5 + $0x88] sm:$0xff]   ;;  %v1116_v31 = vld [vmem:[#allocation5 + $0x80] sm:$0xff]   ;;  %v71_v39 = vpack.c.bf16 %v63_v38, %v63_v38  ;;  %v1117_v40 = vld [vmem:[#allocation5 + $0x178] sm:$0xff]  }
  0x31   :  { %987 = vmatpush3.bf16.msra.mxu1 %v1096_v11  ;;  %966 = vmatprep.subr.bf16.mxu0 %v1097_v12  ;;  %v62_v32 = vld [vmem:[#allocation2 + $0x8] sm:$0xff]  ;;  %v61_v34 = vld [vmem:[#allocation2] sm:$0xff]  ;;  %v1118_v41 = vld [vmem:[#allocation5 + $0x1f8] sm:$0xff]  }
  0x32   :  { %988 = vmatprep.subr.bf16.mxu1 %v1098_v13  ;;  %v70_v35 = vpack.c.bf16 %v62_v32, %v62_v32  ;;  %v69_v37 = vpack.c.bf16 %v61_v34, %v61_v34  ;;  %668 = vmatprep.mubr.bf16.mxu1 %v72_v36  ;;  %v1119_v42 = vld [vmem:[#allocation5 + $0x138] sm:$0xff]   ;;  %v1121_v44 = vld [vmem:[#allocation5 + $0x170] sm:$0xff]   ;;  %v1125_v48 = vld [vmem:[#allocation5 + $0x168] sm:$0xff]  }
  0x33   :  { %v1120_v43 = vld [vmem:[#allocation5 + $0x1b8] sm:$0xff]   ;;  %v1122_v45 = vld [vmem:[#allocation5 + $0x1f0] sm:$0xff]   ;;  %v1126_v49 = vld [vmem:[#allocation5 + $0x1e8] sm:$0xff]  }
  0x34   :  { %967 = vmatpush3.bf16.msra.mxu0 %v1099_v14  ;;  %628 = vmatprep.mubr.bf16.mxu0 %v70_v35  ;;  %v1123_v46 = vld [vmem:[#allocation5 + $0x130] sm:$0xff]   ;;  %v1127_v50 = vld [vmem:[#allocation5 + $0x128] sm:$0xff]   ;;  %v1129_v52 = vld [vmem:[#allocation5 + $0x160] sm:$0xff]  }
  0x35   :  { %989 = vmatpush3.bf16.msra.mxu1 %v1100_v15  ;;  %968 = vmatprep.subr.bf16.mxu0 %v1101_v16  ;;  %v1124_v47 = vld [vmem:[#allocation5 + $0x1b0] sm:$0xff]   ;;  %v1128_v51 = vld [vmem:[#allocation5 + $0x1a8] sm:$0xff]   ;;  %v1130_v53 = vld [vmem:[#allocation5 + $0x1e0] sm:$0xff]  }
  0x36   :  { %990 = vmatprep.subr.bf16.mxu1 %v1102_v17  ;;  %v1131_v54 = vld [vmem:[#allocation5 + $0x120] sm:$0xff]   ;;  %v1133_v56 = vld [vmem:[#allocation5 + $0x158] sm:$0xff]   ;;  %v1137_v60 = vld [vmem:[#allocation5 + $0x150] sm:$0xff]   ;;  %v1248_v17 = vmov 0.0  }
  0x37   :  { %v1132_v55 = vld [vmem:[#allocation5 + $0x1a0] sm:$0xff]   ;;  %v1134_v57 = vld [vmem:[#allocation5 + $0x1d8] sm:$0xff]   ;;  %v1138_v61 = vld [vmem:[#allocation5 + $0x1d0] sm:$0xff]  }
  0x38   :  { %969 = vmatpush3.bf16.msra.mxu0 %v1103_v18  ;;  %v1135_v58 = vld [vmem:[#allocation5 + $0x118] sm:$0xff]   ;;  %v1139_v62 = vld [vmem:[#allocation5 + $0x110] sm:$0xff]   ;;  %v1141_v0 = vld [vmem:[#allocation5 + $0x148] sm:$0xff]  }
  0x39   :  { %991 = vmatpush3.bf16.msra.mxu1 %v1104_v19  ;;  %970 = vmatprep.subr.bf16.mxu0 %v1105_v20  ;;  %v1136_v59 = vld [vmem:[#allocation5 + $0x198] sm:$0xff]   ;;  %v1140_v63 = vld [vmem:[#allocation5 + $0x190] sm:$0xff]   ;;  %v1142_v1 = vld [vmem:[#allocation5 + $0x1c8] sm:$0xff]  }
  0x3a   :  { %992 = vmatprep.subr.bf16.mxu1 %v1106_v21  ;;  %v1143_v2 = vld [vmem:[#allocation5 + $0x108] sm:$0xff]   ;;  %v1145_v4 = vld [vmem:[#allocation5 + $0x140] sm:$0xff]   ;;  %v68_v9 = vld [vmem:[#allocation2 + $0x38] sm:$0xff] }
  0x3b   :  { %v1144_v3 = vld [vmem:[#allocation5 + $0x188] sm:$0xff]   ;;  %v1146_v5 = vld [vmem:[#allocation5 + $0x1c0] sm:$0xff]   ;;  %v76_v11 = vpack.c.bf16 %v68_v9, %v68_v9  ;;  %v67_v13 = vld [vmem:[#allocation2 + $0x30] sm:$0xff] }
  0x3c   :  { %971 = vmatpush3.bf16.msra.mxu0 %v1107_v22  ;;  %v1147_v6 = vld [vmem:[#allocation5 + $0x100] sm:$0xff]   ;;  %v66_v8 = vld [vmem:[#allocation2 + $0x28] sm:$0xff]  ;;  %v75_v15 = vpack.c.bf16 %v67_v13, %v67_v13  ;;  %v1149_v16 = vld [vmem:[#allocation7 + $0x38] sm:$0xff]  }
  0x3d   :  { %993 = vmatpush3.bf16.msra.mxu1 %v1108_v23  ;;  %972 = vmatprep.subr.bf16.mxu0 %v1109_v24  ;;  %v1148_v7 = vld [vmem:[#allocation5 + $0x180] sm:$0xff]   ;;  %v74_v10 = vpack.c.bf16 %v66_v8, %v66_v8  ;;  %v1150_v18 = vld [vmem:[#allocation7 + $0x30] sm:$0xff]   ;;  %v1151_v19 = vld [vmem:[#allocation7 + $0x28] sm:$0xff]  }
  0x3e   :  { %994 = vmatprep.subr.bf16.mxu1 %v1110_v25  ;;  %v65_v12 = vld [vmem:[#allocation2 + $0x20] sm:$0xff]  ;;  %v1153_v21 = vld [vmem:[#allocation7 + $0x18] sm:$0xff]   ;;  %v1154_v22 = vld [vmem:[#allocation7 + $0x10] sm:$0xff]  }
  0x3f   :  { %v73_v14 = vpack.c.bf16 %v65_v12, %v65_v12  ;;  %v1152_v20 = vld [vmem:[#allocation7 + $0x20] sm:$0xff]   ;;  %v1155_v23 = vld [vmem:[#allocation7 + $0x8] sm:$0xff]  }
  0x40   :  { %973 = vmatpush3.bf16.msra.mxu0 %v1111_v26  ;;  %v1156_v24 = vld [vmem:[#allocation7] sm:$0xff]  }
  0x41   :  { %995 = vmatpush3.bf16.msra.mxu1 %v1112_v27  ;;  %974 = vmatprep.subr.bf16.mxu0 %v1113_v28  ;;  %v886_v34 = vld [vmem:[%s1301_s2] ss:$0 sm:$0xff] }
  0x42   :  { %996 = vmatprep.subr.bf16.mxu1 %v1114_v29 }
  0x44   :  { %975 = vmatpush3.bf16.msra.mxu0 %v1115_v30 }
  0x45   :  { %997 = vmatpush3.bf16.msra.mxu1 %v1116_v31  ;;  %1004 = vmatprep.subr.bf16.mxu0 %v1117_v40 }
  0x46   :  { %1026 = vmatprep.subr.bf16.mxu1 %v1118_v41 }
  0x47   :  { %629 = vmatmul.mubr.bf16.vlgmr.msra.gmra.mxu0 %v69_v37 }
  0x48   :  { %669 = vmatmul.mubr.bf16.vlgmr.msra.gmra.mxu1 %v71_v39  ;;  %1005 = vmatpush3.bf16.msra.mxu0 %v1119_v42 }
  0x49   :  { %1027 = vmatpush3.bf16.msra.mxu1 %v1120_v43  ;;  %1006 = vmatprep.subr.bf16.mxu0 %v1121_v44 }
  0x4a   :  { %1028 = vmatprep.subr.bf16.mxu1 %v1122_v45  ;;  %708 = vmatprep.mubr.bf16.mxu0 %v74_v10 }
  0x4b   :  { %748 = vmatprep.mubr.bf16.mxu1 %v76_v11 }
  0x4c   :  { %1007 = vmatpush3.bf16.msra.mxu0 %v1123_v46 }
  0x4d   :  { %1029 = vmatpush3.bf16.msra.mxu1 %v1124_v47  ;;  %1008 = vmatprep.subr.bf16.mxu0 %v1125_v48 }
  0x4e   :  { %1030 = vmatprep.subr.bf16.mxu1 %v1126_v49 }
  0x50   :  { %1009 = vmatpush3.bf16.msra.mxu0 %v1127_v50 }
  0x51   :  { %1031 = vmatpush3.bf16.msra.mxu1 %v1128_v51  ;;  %1010 = vmatprep.subr.bf16.mxu0 %v1129_v52  ;;  %v951_v52 = vld [vmem:[%s1303_s4] ss:$0 sm:$0xff] }
  0x52   :  { %1032 = vmatprep.subr.bf16.mxu1 %v1130_v53 }
  0x54   :  { %1011 = vmatpush3.bf16.msra.mxu0 %v1131_v54 }
  0x55   :  { %1033 = vmatpush3.bf16.msra.mxu1 %v1132_v55  ;;  %1012 = vmatprep.subr.bf16.mxu0 %v1133_v56 }
  0x56   :  { %1034 = vmatprep.subr.bf16.mxu1 %v1134_v57 }
  0x58   :  { %1013 = vmatpush3.bf16.msra.mxu0 %v1135_v58 }
  0x59   :  { %1035 = vmatpush3.bf16.msra.mxu1 %v1136_v59  ;;  %1014 = vmatprep.subr.bf16.mxu0 %v1137_v60 }
  0x5a   :  { %1036 = vmatprep.subr.bf16.mxu1 %v1138_v61 }
  0x5c   :  { %1015 = vmatpush3.bf16.msra.mxu0 %v1139_v62 }
  0x5d   :  { %1037 = vmatpush3.bf16.msra.mxu1 %v1140_v63  ;;  %1016 = vmatprep.subr.bf16.mxu0 %v1141_v0 }
  0x5e   :  { %1038 = vmatprep.subr.bf16.mxu1 %v1142_v1 }
  0x60   :  { %1017 = vmatpush3.bf16.msra.mxu0 %v1143_v2 }
  0x61   :  { %1039 = vmatpush3.bf16.msra.mxu1 %v1144_v3  ;;  %1018 = vmatprep.subr.bf16.mxu0 %v1145_v4 }
  0x62   :  { %1040 = vmatprep.subr.bf16.mxu1 %v1146_v5 }
  0x64   :  { %1019 = vmatpush3.bf16.msra.mxu0 %v1147_v6 }
  0x65   :  { %1041 = vmatpush3.bf16.msra.mxu1 %v1148_v7  ;;  %1057 = vmatprep.subr.bf16.mxu0 %v1248_v17 }
  0x67   :  { %709 = vmatmul.mubr.bf16.vlgmr.msra.gmra.mxu0 %v73_v14 }
  0x68   :  { %749 = vmatmul.mubr.bf16.vlgmr.msra.gmra.mxu1 %v75_v15  ;;  %1058 = vmatpush3.bf16.msra.mxu0 %v1149_v16 }
  0x69   :  { %1059 = vmatprep.subr.bf16.mxu0 %v1248_v17  ;;  %1073 = vmatprep.mubr.msk.bf16.mxu0 %vm1249_vm0, %v1248_v17 }
  0x6c   :  { %1060 = vmatpush3.bf16.msra.mxu0 %v1150_v18 }
  0x6d   :  { %1061 = vmatprep.subr.bf16.mxu0 %v1248_v17 }
  0x70   :  { %1062 = vmatpush3.bf16.msra.mxu0 %v1151_v19 }
  0x71   :  { %1063 = vmatprep.subr.bf16.mxu0 %v1248_v17 }
  0x74   :  { %1064 = vmatpush3.bf16.msra.mxu0 %v1152_v20 }
  0x75   :  { %1065 = vmatprep.subr.bf16.mxu0 %v1248_v17 }
  0x78   :  { %1066 = vmatpush3.bf16.msra.mxu0 %v1153_v21 }
  0x79   :  { %1067 = vmatprep.subr.bf16.mxu0 %v1248_v17 }
  0x7c   :  { %1068 = vmatpush3.bf16.msra.mxu0 %v1154_v22 }
  0x7d   :  { %1069 = vmatprep.subr.bf16.mxu0 %v1248_v17 }
  0x80   :  { %1070 = vmatpush3.bf16.msra.mxu0 %v1155_v23 }
  0x81   :  { %1071 = vmatprep.subr.bf16.mxu0 %v1248_v17 }
  0x84   :  { %1072 = vmatpush3.bf16.msra.mxu0 %v1156_v24 }
 0x107   :  { %v976_v25 = vpop.f32.mrf.mxu0 }
 0x108   :  { %v998_v26 = vpop.f32.mrf.mxu1 }
 0x109   :  { %v977_v27 = vpop.f32.mrf.mxu0 }
 0x10a   :  { %v999_v28 = vpop.f32.mrf.mxu1  ;;  %v978_v33 = vadd.f32 %v977_v27, %v976_v25 }
 0x10b   :  { %v979_v29 = vpop.f32.mrf.mxu0  ;;  %v1000_v36 = vadd.f32 %v999_v28, %v998_v26 }
 0x10c   :  { %v1001_v30 = vpop.f32.mrf.mxu1  ;;  %v631_v35 = vadd.f32 %v978_v33, %v886_v34 }
 0x10d   :  { %v980_v31 = vpop.f32.mrf.mxu0 }
 0x10e   :  { %v1002_v32 = vpop.f32.mrf.mxu1  ;;  %v671_v40 = vadd.f32 %v1000_v36, %v631_v35 }
 0x127   :  { %v1020_v37 = vpop.f32.mrf.mxu0 }
 0x128   :  { %v1042_v38 = vpop.f32.mrf.mxu1 }
 0x129   :  { %v1021_v39 = vpop.f32.mrf.mxu0 }
 0x12a   :  { %v1022_v41 = vadd.f32 %v1021_v39, %v1020_v37  ;;  %v1043_v42 = vpop.f32.mrf.mxu1 }
 0x12b   :  { %v1023_v43 = vpop.f32.mrf.mxu0  ;;  %v1044_v45 = vadd.f32 %v1043_v42, %v1042_v38 }
 0x12c   :  { %v711_v44 = vadd.f32 %v1022_v41, %v671_v40  ;;  %v1045_v46 = vpop.f32.mrf.mxu1 }
 0x12d   :  { %v1024_v47 = vpop.f32.mrf.mxu0 }
 0x12e   :  { %v751_v48 = vadd.f32 %v1044_v45, %v711_v44  ;;  %v1046_v49 = vpop.f32.mrf.mxu1 }
 0x130   :  { %v756_v50 = vmax.f32 %v751_v48, 0.0 }
 0x132   :  { %v757_v51 = vpack.c.bf16 %v756_v50, %v756_v50 }
 0x134   :  { %1074 = vmatmul.mubr.bf16.vlgmr.msra.gmra.mxu0 %v757_v51 }
 0x1f4   :  { %v863_v53 = vpop.f32.mrf.mxu0 }
 0x1f5   :  { %v864_v54 = vadd.f32 %v951_v52, %v863_v53 }
 0x1f6   :  { %v1075_v55 = vpop.f32.mrf.mxu0 }
 0x1f7   :  { %869 = vst [vmem:[#allocation8] sm:$0xff] %v864_v54 }
 0x1f8   :  { %v866_v56 = vpop.f32.mrf.mxu0 }
 0x1f9   :  { %1228 = shalt.err (!%p1225_p5)
}
 0x1fa   :  { %879 = dma.vmem_to_hbm [thread:$0]  %s877_s11, 128, %s1304_s5, [#allocation4]   ;;  %v1076_v57 = vpop.f32.mrf.mxu0 }
 0x1fb   :  { %1241 = dma.done.wait [#allocation4], 128  }
 0x1fc   :  { %1242 = vsyncadd [#allocation4], 4294967168 }
 0x1fd   :  { %883 = vsyncpa [#allocation3], 1 }
 0x1fe   :  { %884 = vsyncpa [#allocation6], 1 }
 0x1ff   :  { %885 = vsyncpa [#allocation4], 1 }

</bundles_post_ra>
